<compile_context>
chip_gen: v6e
topology: v6e:2x2x1
jax: 0.10.0
libtpu: 0.0.40
codegen_flags: <defaults>
</compile_context>

<pallas_src>
import functools

import jax
import jax.numpy as jnp
from jax.experimental import pallas as pl
from jax.experimental.pallas import tpu as pltpu


def _dgwa_kernel(m_ref, at_ref, w1_ref, b1_ref, w2_ref, b2_ref, adp_ref,
                 out_ref, *, top_k, bb, seq, matmul_dtype):
    """One batch-block. Ref shapes:
      m   : (Bb*S, E)    -- MLP rows for all Bb batches flattened together
      at  : (Bb, Ka, S)  -- A pre-transposed in the wrapper
      w1  : (E, H), b1 : (1, H), w2 : (H, E), b2 : (1, E), adp : (E, N)
      out : (Bb, Ka, N)
    """
    if matmul_dtype is not None:
        cast = lambda x: x.astype(matmul_dtype)
    else:
        cast = lambda x: x

    m = m_ref[...]                                                    # (Bb*S, E)

    # --- MLP: Linear -> ReLU -> Linear (one big MXU pass over Bb*S rows) ---
    h = jnp.dot(cast(m), cast(w1_ref[...]),
                preferred_element_type=jnp.float32) + b1_ref[...]
    h = jnp.maximum(h, 0.0)
    mh = jnp.dot(cast(h), cast(w2_ref[...]),
                 preferred_element_type=jnp.float32) + b2_ref[...]    # (Bb*S, E)

    # --- E = MLP(M) @ adpvec ------------------------------------------------
    e = jnp.dot(cast(mh), cast(adp_ref[...]),
                preferred_element_type=jnp.float32)                   # (Bb*S, N)
    rows, n = e.shape

    # --- toph: per row keep entries >= (top_k)-th largest, else 0 ----------
    # Matches torch.sort(descending)[..., top_k-1] tie semantics exactly:
    # threshold = max{ v in row : #(row >= v) >= top_k }.
    # TODO(synk): for large num_nodes replace this O(N^2) unrolled counting
    # selection with a bisection / sorting-network k-select (avoids N serial
    # XLU reductions and the long VALU maximum chain).
    th = jnp.full((rows, 1), -jnp.inf, dtype=jnp.float32)
    for i in range(n):
        xi = e[:, i:i + 1]                                            # (rows, 1)
        cnt = jnp.sum((e >= xi).astype(jnp.float32), axis=-1, keepdims=True)
        th = jnp.maximum(th, jnp.where(cnt >= float(top_k), xi, -jnp.inf))
    e_adp = jnp.where(e >= th, e, 0.0)                                # (rows, N)

    # --- A_adp = softmax(relu(A^T @ E_adp), axis=-1) ------------------------
    e_adp = e_adp.reshape(bb, seq, n)                                 # (Bb, S, N)
    s = jnp.einsum('bks,bsn->bkn', cast(at_ref[...]), cast(e_adp),
                   preferred_element_type=jnp.float32)                # (Bb, Ka, N)
    s = jnp.maximum(s, 0.0)
    s_max = jnp.max(s, axis=-1, keepdims=True)
    ex = jnp.exp(s - s_max)
    denom = jnp.sum(ex, axis=-1, keepdims=True)
    out_ref[...] = ex * pl.reciprocal(denom, approx=True)             # EUP divide


def _pick_batch_block(batch, seq, target_rows=512):
    """Largest Bb that divides `batch`, keeps >= 2 grid steps when batch > 1
    (v7x has two TensorCores), and keeps ~target_rows flattened MLP rows per
    step so the per-grid-step overhead is amortized without blowing the
    (generation-dependent) VMEM budget."""
    if batch <= 1:
        return 1
    cap = max(1, min(batch // 2, max(1, target_rows // max(seq, 1))))
    for bb in range(cap, 0, -1):
        if batch % bb == 0:
            return bb
    return 1


def dynamic_g_with_attention_v2(A, M, params, embed_dim, *,
                                batch_block=None, matmul_dtype=None):
    """JAX/Pallas equivalent of Dynamic_G_with_Attention_v2.forward.

    A: (B, S, Ka), M: (B, S, F). Only the leading min(F, 2*embed_dim) ==
    embed_dim features of M are used (as in the module). Returns
    A_adp: (B, Ka, num_nodes), softmax over the last axis.
    """
    ed = 2 * embed_dim
    M = M[..., :ed]                        # matches M[:, :, :self.ed]

    w1, b1, w2, b2, adp = (params["w1"], params["b1"], params["w2"],
                           params["b2"], params["adpvec"])
    assert M.shape[-1] == w1.shape[0], (
        "M feature dim after the [:2*embed_dim] slice must equal embed_dim "
        f"(got {M.shape[-1]} vs {w1.shape[0]})")

    B, S, E = M.shape
    _, _, Ka = A.shape
    H = w1.shape[1]
    N = adp.shape[1]
    top_k = max(1, int(N * 0.5))           # guard top_k >= 1 for tiny N

    Bb = batch_block if batch_block is not None else _pick_batch_block(B, S)
    assert B % Bb == 0, f"batch block {Bb} must divide batch {B}"
    G = B // Bb

    # Wrapper-side layout plumbing (free for XLA, keeps the kernel's MXU feed
    # clean): flatten batch into the MLP row dim and pre-transpose A.
    m2d = M.reshape(B * S, E).astype(jnp.float32)
    at = jnp.swapaxes(A, -1, -2).astype(jnp.float32)      # (B, Ka, S)

    kernel = functools.partial(_dgwa_kernel, top_k=top_k, bb=Bb, seq=S,
                               matmul_dtype=matmul_dtype)

    return pl.pallas_call(
        kernel,
        out_shape=jax.ShapeDtypeStruct((B, Ka, N), jnp.float32),
        grid_spec=pltpu.PrefetchScalarGridSpec(
            num_scalar_prefetch=0,
            grid=(G,),
            in_specs=[
                pl.BlockSpec((Bb * S, E), lambda i: (i, 0)),     # M rows (batch-blocked)
                pl.BlockSpec((Bb, Ka, S), lambda i: (i, 0, 0)),  # A^T batch block
                pl.BlockSpec((E, H), lambda i: (0, 0)),          # W1 (grid-invariant)
                pl.BlockSpec((1, H), lambda i: (0, 0)),          # b1
                pl.BlockSpec((H, E), lambda i: (0, 0)),          # W2
                pl.BlockSpec((1, E), lambda i: (0, 0)),          # b2
                pl.BlockSpec((E, N), lambda i: (0, 0)),          # adpvec
            ],
            out_specs=pl.BlockSpec((Bb, Ka, N), lambda i: (i, 0, 0)),
        ),
        compiler_params=pltpu.CompilerParams(
            dimension_semantics=("parallel",)),
    )(m2d, at, w1, b1, w2, b2, adp)


def _reference(A, M, params, embed_dim):
    """Pure-JAX reference mirroring the PyTorch module."""
    ed = 2 * embed_dim
    x = M[..., :ed]
    h = jax.nn.relu(x @ params["w1"] + params["b1"])
    x = h @ params["w2"] + params["b2"]
    e = x @ params["adpvec"]
    n = e.shape[-1]
    k = max(1, int(n * 0.5))
    th = jnp.sort(e, axis=-1)[..., ::-1][..., k - 1]
    e_adp = jnp.where(e >= th[..., None], e, 0.0)
    s = jax.nn.relu(jnp.swapaxes(A, -1, -2) @ e_adp)
    return jax.nn.softmax(s, axis=-1)


if __name__ == "__main__":
    # Small shapes consistent with the module's forward pass.
    B, S, Ka = 2, 8, 8
    embed_dim, hidden_dim, num_nodes = 8, 32, 16

    key = jax.random.PRNGKey(0)
    k_m, k_a, k_adp, k_w1, k_b1, k_w2, k_b2 = jax.random.split(key, 7)

    # Deterministic synthetic parameters (shapes from __init__).
    params = {
        "adpvec": jax.random.normal(k_adp, (embed_dim, num_nodes), jnp.float32),
        "w1": 0.2 * jax.random.normal(k_w1, (embed_dim, hidden_dim), jnp.float32),
        "b1": 0.1 * jax.random.normal(k_b1, (1, hidden_dim), jnp.float32),
        "w2": 0.2 * jax.random.normal(k_w2, (hidden_dim, embed_dim), jnp.float32),
        "b2": 0.1 * jax.random.normal(k_b2, (1, embed_dim), jnp.float32),
    }

    M = jax.random.normal(k_m, (B, S, embed_dim), jnp.float32)
    A = jax.random.normal(k_a, (B, S, Ka), jnp.float32)

    out = dynamic_g_with_attention_v2(A, M, params, embed_dim)
    out = jax.block_until_ready(out)

    ref = jax.block_until_ready(_reference(A, M, params, embed_dim))
    assert out.shape == (B, Ka, num_nodes)
    # approx reciprocal (EUP) in the softmax epilogue -> slightly looser tol.
    assert jnp.allclose(out, ref, atol=2e-3, rtol=2e-3), "mismatch vs reference"

    print("KERNEL_OK")
</pallas_src>

<mosaic_0001>
module attributes {stable_mosaic.version = 11 : i64} {
  func.func @_dgwa_kernel(%arg0: i32, %arg1: memref<8x8xf32, #tpu.memory_space<vmem>>, %arg2: memref<1x8x8xf32, #tpu.memory_space<vmem>>, %arg3: memref<8x32xf32, #tpu.memory_space<vmem>>, %arg4: memref<1x32xf32, #tpu.memory_space<vmem>>, %arg5: memref<32x8xf32, #tpu.memory_space<vmem>>, %arg6: memref<1x8xf32, #tpu.memory_space<vmem>>, %arg7: memref<8x16xf32, #tpu.memory_space<vmem>>, %arg8: memref<1x8x16xf32, #tpu.memory_space<vmem>>) attributes {dimension_semantics = [#tpu.dimension_semantics<parallel>], iteration_bounds = array<i64: 2>, scalar_prefetch = 0 : i64, scratch_operands = 0 : i64, tpu.core_type = #tpu.core_type<tc>, window_params = [{transform_indices = @transform_0, window_bounds = array<i64: 8, 8>}, {transform_indices = @transform_1, window_bounds = array<i64: 1, 8, 8>}, {pipeline_mode = #tpu.pipeline_mode<synchronous>, transform_indices = @transform_2, window_bounds = array<i64: 8, 32>}, {pipeline_mode = #tpu.pipeline_mode<synchronous>, transform_indices = @transform_3, window_bounds = array<i64: 1, 32>}, {pipeline_mode = #tpu.pipeline_mode<synchronous>, transform_indices = @transform_4, window_bounds = array<i64: 32, 8>}, {pipeline_mode = #tpu.pipeline_mode<synchronous>, transform_indices = @transform_5, window_bounds = array<i64: 1, 8>}, {pipeline_mode = #tpu.pipeline_mode<synchronous>, transform_indices = @transform_6, window_bounds = array<i64: 8, 16>}, {transform_indices = @transform_7, window_bounds = array<i64: 1, 8, 16>}]} {
    %c0 = arith.constant 0 : index
    %c0_0 = arith.constant 0 : index
    %0 = vector.load %arg1[%c0, %c0_0] : memref<8x8xf32, #tpu.memory_space<vmem>>, vector<8x8xf32>
    %c0_1 = arith.constant 0 : index
    %c0_2 = arith.constant 0 : index
    %1 = vector.load %arg3[%c0_1, %c0_2] : memref<8x32xf32, #tpu.memory_space<vmem>>, vector<8x32xf32>
    %cst = arith.constant dense<0.000000e+00> : vector<8x32xf32>
    %2 = tpu.matmul %0, %1, %cst {dimension_numbers = #tpu.dot_dimension_numbers<[1], [0], [0], [1], [0, 0, 1, 1], [], []>} : vector<8x8xf32>, vector<8x32xf32>, vector<8x32xf32> -> vector<8x32xf32>
    %c0_3 = arith.constant 0 : index
    %c0_4 = arith.constant 0 : index
    %3 = vector.load %arg4[%c0_3, %c0_4] : memref<1x32xf32, #tpu.memory_space<vmem>>, vector<1x32xf32>
    %4 = vector.broadcast %3 : vector<1x32xf32> to vector<8x32xf32>
    %5 = arith.addf %2, %4 : vector<8x32xf32>
    %cst_5 = arith.constant 0.000000e+00 : f32
    %6 = vector.broadcast %cst_5 : f32 to vector<8x32xf32>
    %7 = arith.maximumf %5, %6 : vector<8x32xf32>
    %c0_6 = arith.constant 0 : index
    %c0_7 = arith.constant 0 : index
    %8 = vector.load %arg5[%c0_6, %c0_7] : memref<32x8xf32, #tpu.memory_space<vmem>>, vector<32x8xf32>
    %cst_8 = arith.constant dense<0.000000e+00> : vector<8x8xf32>
    %9 = tpu.matmul %7, %8, %cst_8 {dimension_numbers = #tpu.dot_dimension_numbers<[1], [0], [0], [1], [0, 0, 1, 1], [], []>} : vector<8x32xf32>, vector<32x8xf32>, vector<8x8xf32> -> vector<8x8xf32>
    %c0_9 = arith.constant 0 : index
    %c0_10 = arith.constant 0 : index
    %10 = vector.load %arg6[%c0_9, %c0_10] : memref<1x8xf32, #tpu.memory_space<vmem>>, vector<1x8xf32>
    %11 = vector.broadcast %10 : vector<1x8xf32> to vector<8x8xf32>
    %12 = arith.addf %9, %11 : vector<8x8xf32>
    %c0_11 = arith.constant 0 : index
    %c0_12 = arith.constant 0 : index
    %13 = vector.load %arg7[%c0_11, %c0_12] : memref<8x16xf32, #tpu.memory_space<vmem>>, vector<8x16xf32>
    %cst_13 = arith.constant dense<0.000000e+00> : vector<8x16xf32>
    %14 = tpu.matmul %12, %13, %cst_13 {dimension_numbers = #tpu.dot_dimension_numbers<[1], [0], [0], [1], [0, 0, 1, 1], [], []>} : vector<8x8xf32>, vector<8x16xf32>, vector<8x16xf32> -> vector<8x16xf32>
    %cst_14 = arith.constant 0xFF800000 : f32
    %15 = vector.broadcast %cst_14 : f32 to vector<8x1xf32>
    %16 = vector.extract_strided_slice %14 {offsets = [0, 0], sizes = [8, 1], strides = [1, 1]} : vector<8x16xf32> to vector<8x1xf32>
    %17 = vector.broadcast %16 : vector<8x1xf32> to vector<8x16xf32>
    %18 = arith.cmpf oge, %14, %17 : vector<8x16xf32>
    %19 = arith.extui %18 : vector<8x16xi1> to vector<8x16xi32>
    %20 = arith.sitofp %19 : vector<8x16xi32> to vector<8x16xf32>
    %cst_15 = arith.constant dense<0.000000e+00> : vector<8xf32>
    %21 = vector.multi_reduction <add>, %20, %cst_15 [1] : vector<8x16xf32> to vector<8xf32>
    %22 = vector.shape_cast %21 : vector<8xf32> to vector<8x1xf32>
    %cst_16 = arith.constant 8.000000e+00 : f32
    %23 = vector.broadcast %cst_16 : f32 to vector<8x1xf32>
    %24 = arith.cmpf oge, %22, %23 : vector<8x1xf32>
    %cst_17 = arith.constant 0xFF800000 : f32
    %25 = vector.broadcast %cst_17 : f32 to vector<8x1xf32>
    %26 = arith.select %24, %16, %25 : vector<8x1xi1>, vector<8x1xf32>
    %27 = arith.maximumf %15, %26 : vector<8x1xf32>
    %28 = vector.extract_strided_slice %14 {offsets = [0, 1], sizes = [8, 1], strides = [1, 1]} : vector<8x16xf32> to vector<8x1xf32>
    %29 = vector.broadcast %28 : vector<8x1xf32> to vector<8x16xf32>
    %30 = arith.cmpf oge, %14, %29 : vector<8x16xf32>
    %31 = arith.extui %30 : vector<8x16xi1> to vector<8x16xi32>
    %32 = arith.sitofp %31 : vector<8x16xi32> to vector<8x16xf32>
    %cst_18 = arith.constant dense<0.000000e+00> : vector<8xf32>
    %33 = vector.multi_reduction <add>, %32, %cst_18 [1] : vector<8x16xf32> to vector<8xf32>
    %34 = vector.shape_cast %33 : vector<8xf32> to vector<8x1xf32>
    %cst_19 = arith.constant 8.000000e+00 : f32
    %35 = vector.broadcast %cst_19 : f32 to vector<8x1xf32>
    %36 = arith.cmpf oge, %34, %35 : vector<8x1xf32>
    %cst_20 = arith.constant 0xFF800000 : f32
    %37 = vector.broadcast %cst_20 : f32 to vector<8x1xf32>
    %38 = arith.select %36, %28, %37 : vector<8x1xi1>, vector<8x1xf32>
    %39 = arith.maximumf %27, %38 : vector<8x1xf32>
    %40 = vector.extract_strided_slice %14 {offsets = [0, 2], sizes = [8, 1], strides = [1, 1]} : vector<8x16xf32> to vector<8x1xf32>
    %41 = vector.broadcast %40 : vector<8x1xf32> to vector<8x16xf32>
    %42 = arith.cmpf oge, %14, %41 : vector<8x16xf32>
    %43 = arith.extui %42 : vector<8x16xi1> to vector<8x16xi32>
    %44 = arith.sitofp %43 : vector<8x16xi32> to vector<8x16xf32>
    %cst_21 = arith.constant dense<0.000000e+00> : vector<8xf32>
    %45 = vector.multi_reduction <add>, %44, %cst_21 [1] : vector<8x16xf32> to vector<8xf32>
    %46 = vector.shape_cast %45 : vector<8xf32> to vector<8x1xf32>
    %cst_22 = arith.constant 8.000000e+00 : f32
    %47 = vector.broadcast %cst_22 : f32 to vector<8x1xf32>
    %48 = arith.cmpf oge, %46, %47 : vector<8x1xf32>
    %cst_23 = arith.constant 0xFF800000 : f32
    %49 = vector.broadcast %cst_23 : f32 to vector<8x1xf32>
    %50 = arith.select %48, %40, %49 : vector<8x1xi1>, vector<8x1xf32>
    %51 = arith.maximumf %39, %50 : vector<8x1xf32>
    %52 = vector.extract_strided_slice %14 {offsets = [0, 3], sizes = [8, 1], strides = [1, 1]} : vector<8x16xf32> to vector<8x1xf32>
    %53 = vector.broadcast %52 : vector<8x1xf32> to vector<8x16xf32>
    %54 = arith.cmpf oge, %14, %53 : vector<8x16xf32>
    %55 = arith.extui %54 : vector<8x16xi1> to vector<8x16xi32>
    %56 = arith.sitofp %55 : vector<8x16xi32> to vector<8x16xf32>
    %cst_24 = arith.constant dense<0.000000e+00> : vector<8xf32>
    %57 = vector.multi_reduction <add>, %56, %cst_24 [1] : vector<8x16xf32> to vector<8xf32>
    %58 = vector.shape_cast %57 : vector<8xf32> to vector<8x1xf32>
    %cst_25 = arith.constant 8.000000e+00 : f32
    %59 = vector.broadcast %cst_25 : f32 to vector<8x1xf32>
    %60 = arith.cmpf oge, %58, %59 : vector<8x1xf32>
    %cst_26 = arith.constant 0xFF800000 : f32
    %61 = vector.broadcast %cst_26 : f32 to vector<8x1xf32>
    %62 = arith.select %60, %52, %61 : vector<8x1xi1>, vector<8x1xf32>
    %63 = arith.maximumf %51, %62 : vector<8x1xf32>
    %64 = vector.extract_strided_slice %14 {offsets = [0, 4], sizes = [8, 1], strides = [1, 1]} : vector<8x16xf32> to vector<8x1xf32>
    %65 = vector.broadcast %64 : vector<8x1xf32> to vector<8x16xf32>
    %66 = arith.cmpf oge, %14, %65 : vector<8x16xf32>
    %67 = arith.extui %66 : vector<8x16xi1> to vector<8x16xi32>
    %68 = arith.sitofp %67 : vector<8x16xi32> to vector<8x16xf32>
    %cst_27 = arith.constant dense<0.000000e+00> : vector<8xf32>
    %69 = vector.multi_reduction <add>, %68, %cst_27 [1] : vector<8x16xf32> to vector<8xf32>
    %70 = vector.shape_cast %69 : vector<8xf32> to vector<8x1xf32>
    %cst_28 = arith.constant 8.000000e+00 : f32
    %71 = vector.broadcast %cst_28 : f32 to vector<8x1xf32>
    %72 = arith.cmpf oge, %70, %71 : vector<8x1xf32>
    %cst_29 = arith.constant 0xFF800000 : f32
    %73 = vector.broadcast %cst_29 : f32 to vector<8x1xf32>
    %74 = arith.select %72, %64, %73 : vector<8x1xi1>, vector<8x1xf32>
    %75 = arith.maximumf %63, %74 : vector<8x1xf32>
    %76 = vector.extract_strided_slice %14 {offsets = [0, 5], sizes = [8, 1], strides = [1, 1]} : vector<8x16xf32> to vector<8x1xf32>
    %77 = vector.broadcast %76 : vector<8x1xf32> to vector<8x16xf32>
    %78 = arith.cmpf oge, %14, %77 : vector<8x16xf32>
    %79 = arith.extui %78 : vector<8x16xi1> to vector<8x16xi32>
    %80 = arith.sitofp %79 : vector<8x16xi32> to vector<8x16xf32>
    %cst_30 = arith.constant dense<0.000000e+00> : vector<8xf32>
    %81 = vector.multi_reduction <add>, %80, %cst_30 [1] : vector<8x16xf32> to vector<8xf32>
    %82 = vector.shape_cast %81 : vector<8xf32> to vector<8x1xf32>
    %cst_31 = arith.constant 8.000000e+00 : f32
    %83 = vector.broadcast %cst_31 : f32 to vector<8x1xf32>
    %84 = arith.cmpf oge, %82, %83 : vector<8x1xf32>
    %cst_32 = arith.constant 0xFF800000 : f32
    %85 = vector.broadcast %cst_32 : f32 to vector<8x1xf32>
    %86 = arith.select %84, %76, %85 : vector<8x1xi1>, vector<8x1xf32>
    %87 = arith.maximumf %75, %86 : vector<8x1xf32>
    %88 = vector.extract_strided_slice %14 {offsets = [0, 6], sizes = [8, 1], strides = [1, 1]} : vector<8x16xf32> to vector<8x1xf32>
    %89 = vector.broadcast %88 : vector<8x1xf32> to vector<8x16xf32>
    %90 = arith.cmpf oge, %14, %89 : vector<8x16xf32>
    %91 = arith.extui %90 : vector<8x16xi1> to vector<8x16xi32>
    %92 = arith.sitofp %91 : vector<8x16xi32> to vector<8x16xf32>
    %cst_33 = arith.constant dense<0.000000e+00> : vector<8xf32>
    %93 = vector.multi_reduction <add>, %92, %cst_33 [1] : vector<8x16xf32> to vector<8xf32>
    %94 = vector.shape_cast %93 : vector<8xf32> to vector<8x1xf32>
    %cst_34 = arith.constant 8.000000e+00 : f32
    %95 = vector.broadcast %cst_34 : f32 to vector<8x1xf32>
    %96 = arith.cmpf oge, %94, %95 : vector<8x1xf32>
    %cst_35 = arith.constant 0xFF800000 : f32
    %97 = vector.broadcast %cst_35 : f32 to vector<8x1xf32>
    %98 = arith.select %96, %88, %97 : vector<8x1xi1>, vector<8x1xf32>
    %99 = arith.maximumf %87, %98 : vector<8x1xf32>
    %100 = vector.extract_strided_slice %14 {offsets = [0, 7], sizes = [8, 1], strides = [1, 1]} : vector<8x16xf32> to vector<8x1xf32>
    %101 = vector.broadcast %100 : vector<8x1xf32> to vector<8x16xf32>
    %102 = arith.cmpf oge, %14, %101 : vector<8x16xf32>
    %103 = arith.extui %102 : vector<8x16xi1> to vector<8x16xi32>
    %104 = arith.sitofp %103 : vector<8x16xi32> to vector<8x16xf32>
    %cst_36 = arith.constant dense<0.000000e+00> : vector<8xf32>
    %105 = vector.multi_reduction <add>, %104, %cst_36 [1] : vector<8x16xf32> to vector<8xf32>
    %106 = vector.shape_cast %105 : vector<8xf32> to vector<8x1xf32>
    %cst_37 = arith.constant 8.000000e+00 : f32
    %107 = vector.broadcast %cst_37 : f32 to vector<8x1xf32>
    %108 = arith.cmpf oge, %106, %107 : vector<8x1xf32>
    %cst_38 = arith.constant 0xFF800000 : f32
    %109 = vector.broadcast %cst_38 : f32 to vector<8x1xf32>
    %110 = arith.select %108, %100, %109 : vector<8x1xi1>, vector<8x1xf32>
    %111 = arith.maximumf %99, %110 : vector<8x1xf32>
    %112 = vector.extract_strided_slice %14 {offsets = [0, 8], sizes = [8, 1], strides = [1, 1]} : vector<8x16xf32> to vector<8x1xf32>
    %113 = vector.broadcast %112 : vector<8x1xf32> to vector<8x16xf32>
    %114 = arith.cmpf oge, %14, %113 : vector<8x16xf32>
    %115 = arith.extui %114 : vector<8x16xi1> to vector<8x16xi32>
    %116 = arith.sitofp %115 : vector<8x16xi32> to vector<8x16xf32>
    %cst_39 = arith.constant dense<0.000000e+00> : vector<8xf32>
    %117 = vector.multi_reduction <add>, %116, %cst_39 [1] : vector<8x16xf32> to vector<8xf32>
    %118 = vector.shape_cast %117 : vector<8xf32> to vector<8x1xf32>
    %cst_40 = arith.constant 8.000000e+00 : f32
    %119 = vector.broadcast %cst_40 : f32 to vector<8x1xf32>
    %120 = arith.cmpf oge, %118, %119 : vector<8x1xf32>
    %cst_41 = arith.constant 0xFF800000 : f32
    %121 = vector.broadcast %cst_41 : f32 to vector<8x1xf32>
    %122 = arith.select %120, %112, %121 : vector<8x1xi1>, vector<8x1xf32>
    %123 = arith.maximumf %111, %122 : vector<8x1xf32>
    %124 = vector.extract_strided_slice %14 {offsets = [0, 9], sizes = [8, 1], strides = [1, 1]} : vector<8x16xf32> to vector<8x1xf32>
    %125 = vector.broadcast %124 : vector<8x1xf32> to vector<8x16xf32>
    %126 = arith.cmpf oge, %14, %125 : vector<8x16xf32>
    %127 = arith.extui %126 : vector<8x16xi1> to vector<8x16xi32>
    %128 = arith.sitofp %127 : vector<8x16xi32> to vector<8x16xf32>
    %cst_42 = arith.constant dense<0.000000e+00> : vector<8xf32>
    %129 = vector.multi_reduction <add>, %128, %cst_42 [1] : vector<8x16xf32> to vector<8xf32>
    %130 = vector.shape_cast %129 : vector<8xf32> to vector<8x1xf32>
    %cst_43 = arith.constant 8.000000e+00 : f32
    %131 = vector.broadcast %cst_43 : f32 to vector<8x1xf32>
    %132 = arith.cmpf oge, %130, %131 : vector<8x1xf32>
    %cst_44 = arith.constant 0xFF800000 : f32
    %133 = vector.broadcast %cst_44 : f32 to vector<8x1xf32>
    %134 = arith.select %132, %124, %133 : vector<8x1xi1>, vector<8x1xf32>
    %135 = arith.maximumf %123, %134 : vector<8x1xf32>
    %136 = vector.extract_strided_slice %14 {offsets = [0, 10], sizes = [8, 1], strides = [1, 1]} : vector<8x16xf32> to vector<8x1xf32>
    %137 = vector.broadcast %136 : vector<8x1xf32> to vector<8x16xf32>
    %138 = arith.cmpf oge, %14, %137 : vector<8x16xf32>
    %139 = arith.extui %138 : vector<8x16xi1> to vector<8x16xi32>
    %140 = arith.sitofp %139 : vector<8x16xi32> to vector<8x16xf32>
    %cst_45 = arith.constant dense<0.000000e+00> : vector<8xf32>
    %141 = vector.multi_reduction <add>, %140, %cst_45 [1] : vector<8x16xf32> to vector<8xf32>
    %142 = vector.shape_cast %141 : vector<8xf32> to vector<8x1xf32>
    %cst_46 = arith.constant 8.000000e+00 : f32
    %143 = vector.broadcast %cst_46 : f32 to vector<8x1xf32>
    %144 = arith.cmpf oge, %142, %143 : vector<8x1xf32>
    %cst_47 = arith.constant 0xFF800000 : f32
    %145 = vector.broadcast %cst_47 : f32 to vector<8x1xf32>
    %146 = arith.select %144, %136, %145 : vector<8x1xi1>, vector<8x1xf32>
    %147 = arith.maximumf %135, %146 : vector<8x1xf32>
    %148 = vector.extract_strided_slice %14 {offsets = [0, 11], sizes = [8, 1], strides = [1, 1]} : vector<8x16xf32> to vector<8x1xf32>
    %149 = vector.broadcast %148 : vector<8x1xf32> to vector<8x16xf32>
    %150 = arith.cmpf oge, %14, %149 : vector<8x16xf32>
    %151 = arith.extui %150 : vector<8x16xi1> to vector<8x16xi32>
    %152 = arith.sitofp %151 : vector<8x16xi32> to vector<8x16xf32>
    %cst_48 = arith.constant dense<0.000000e+00> : vector<8xf32>
    %153 = vector.multi_reduction <add>, %152, %cst_48 [1] : vector<8x16xf32> to vector<8xf32>
    %154 = vector.shape_cast %153 : vector<8xf32> to vector<8x1xf32>
    %cst_49 = arith.constant 8.000000e+00 : f32
    %155 = vector.broadcast %cst_49 : f32 to vector<8x1xf32>
    %156 = arith.cmpf oge, %154, %155 : vector<8x1xf32>
    %cst_50 = arith.constant 0xFF800000 : f32
    %157 = vector.broadcast %cst_50 : f32 to vector<8x1xf32>
    %158 = arith.select %156, %148, %157 : vector<8x1xi1>, vector<8x1xf32>
    %159 = arith.maximumf %147, %158 : vector<8x1xf32>
    %160 = vector.extract_strided_slice %14 {offsets = [0, 12], sizes = [8, 1], strides = [1, 1]} : vector<8x16xf32> to vector<8x1xf32>
    %161 = vector.broadcast %160 : vector<8x1xf32> to vector<8x16xf32>
    %162 = arith.cmpf oge, %14, %161 : vector<8x16xf32>
    %163 = arith.extui %162 : vector<8x16xi1> to vector<8x16xi32>
    %164 = arith.sitofp %163 : vector<8x16xi32> to vector<8x16xf32>
    %cst_51 = arith.constant dense<0.000000e+00> : vector<8xf32>
    %165 = vector.multi_reduction <add>, %164, %cst_51 [1] : vector<8x16xf32> to vector<8xf32>
    %166 = vector.shape_cast %165 : vector<8xf32> to vector<8x1xf32>
    %cst_52 = arith.constant 8.000000e+00 : f32
    %167 = vector.broadcast %cst_52 : f32 to vector<8x1xf32>
    %168 = arith.cmpf oge, %166, %167 : vector<8x1xf32>
    %cst_53 = arith.constant 0xFF800000 : f32
    %169 = vector.broadcast %cst_53 : f32 to vector<8x1xf32>
    %170 = arith.select %168, %160, %169 : vector<8x1xi1>, vector<8x1xf32>
    %171 = arith.maximumf %159, %170 : vector<8x1xf32>
    %172 = vector.extract_strided_slice %14 {offsets = [0, 13], sizes = [8, 1], strides = [1, 1]} : vector<8x16xf32> to vector<8x1xf32>
    %173 = vector.broadcast %172 : vector<8x1xf32> to vector<8x16xf32>
    %174 = arith.cmpf oge, %14, %173 : vector<8x16xf32>
    %175 = arith.extui %174 : vector<8x16xi1> to vector<8x16xi32>
    %176 = arith.sitofp %175 : vector<8x16xi32> to vector<8x16xf32>
    %cst_54 = arith.constant dense<0.000000e+00> : vector<8xf32>
    %177 = vector.multi_reduction <add>, %176, %cst_54 [1] : vector<8x16xf32> to vector<8xf32>
    %178 = vector.shape_cast %177 : vector<8xf32> to vector<8x1xf32>
    %cst_55 = arith.constant 8.000000e+00 : f32
    %179 = vector.broadcast %cst_55 : f32 to vector<8x1xf32>
    %180 = arith.cmpf oge, %178, %179 : vector<8x1xf32>
    %cst_56 = arith.constant 0xFF800000 : f32
    %181 = vector.broadcast %cst_56 : f32 to vector<8x1xf32>
    %182 = arith.select %180, %172, %181 : vector<8x1xi1>, vector<8x1xf32>
    %183 = arith.maximumf %171, %182 : vector<8x1xf32>
    %184 = vector.extract_strided_slice %14 {offsets = [0, 14], sizes = [8, 1], strides = [1, 1]} : vector<8x16xf32> to vector<8x1xf32>
    %185 = vector.broadcast %184 : vector<8x1xf32> to vector<8x16xf32>
    %186 = arith.cmpf oge, %14, %185 : vector<8x16xf32>
    %187 = arith.extui %186 : vector<8x16xi1> to vector<8x16xi32>
    %188 = arith.sitofp %187 : vector<8x16xi32> to vector<8x16xf32>
    %cst_57 = arith.constant dense<0.000000e+00> : vector<8xf32>
    %189 = vector.multi_reduction <add>, %188, %cst_57 [1] : vector<8x16xf32> to vector<8xf32>
    %190 = vector.shape_cast %189 : vector<8xf32> to vector<8x1xf32>
    %cst_58 = arith.constant 8.000000e+00 : f32
    %191 = vector.broadcast %cst_58 : f32 to vector<8x1xf32>
    %192 = arith.cmpf oge, %190, %191 : vector<8x1xf32>
    %cst_59 = arith.constant 0xFF800000 : f32
    %193 = vector.broadcast %cst_59 : f32 to vector<8x1xf32>
    %194 = arith.select %192, %184, %193 : vector<8x1xi1>, vector<8x1xf32>
    %195 = arith.maximumf %183, %194 : vector<8x1xf32>
    %196 = vector.extract_strided_slice %14 {offsets = [0, 15], sizes = [8, 1], strides = [1, 1]} : vector<8x16xf32> to vector<8x1xf32>
    %197 = vector.broadcast %196 : vector<8x1xf32> to vector<8x16xf32>
    %198 = arith.cmpf oge, %14, %197 : vector<8x16xf32>
    %199 = arith.extui %198 : vector<8x16xi1> to vector<8x16xi32>
    %200 = arith.sitofp %199 : vector<8x16xi32> to vector<8x16xf32>
    %cst_60 = arith.constant dense<0.000000e+00> : vector<8xf32>
    %201 = vector.multi_reduction <add>, %200, %cst_60 [1] : vector<8x16xf32> to vector<8xf32>
    %202 = vector.shape_cast %201 : vector<8xf32> to vector<8x1xf32>
    %cst_61 = arith.constant 8.000000e+00 : f32
    %203 = vector.broadcast %cst_61 : f32 to vector<8x1xf32>
    %204 = arith.cmpf oge, %202, %203 : vector<8x1xf32>
    %cst_62 = arith.constant 0xFF800000 : f32
    %205 = vector.broadcast %cst_62 : f32 to vector<8x1xf32>
    %206 = arith.select %204, %196, %205 : vector<8x1xi1>, vector<8x1xf32>
    %207 = arith.maximumf %195, %206 : vector<8x1xf32>
    %208 = vector.broadcast %207 : vector<8x1xf32> to vector<8x16xf32>
    %209 = arith.cmpf oge, %14, %208 : vector<8x16xf32>
    %cst_63 = arith.constant 0.000000e+00 : f32
    %210 = vector.broadcast %cst_63 : f32 to vector<8x16xf32>
    %211 = arith.select %209, %14, %210 : vector<8x16xi1>, vector<8x16xf32>
    %212 = vector.shape_cast %211 : vector<8x16xf32> to vector<1x8x16xf32>
    %c0_64 = arith.constant 0 : index
    %c0_65 = arith.constant 0 : index
    %c0_66 = arith.constant 0 : index
    %213 = vector.load %arg2[%c0_64, %c0_65, %c0_66] : memref<1x8x8xf32, #tpu.memory_space<vmem>>, vector<1x8x8xf32>
    "tpu.trace_start"() <{level = 10 : i32, message = "bks,bsn->bkn"}> : () -> ()
    %cst_67 = arith.constant dense<0.000000e+00> : vector<1x8x16xf32>
    %214 = tpu.matmul %213, %212, %cst_67 {dimension_numbers = #tpu.dot_dimension_numbers<[2], [1], [1], [2], [0, 0, 0, 1, 1, 2], [0], [0]>} : vector<1x8x8xf32>, vector<1x8x16xf32>, vector<1x8x16xf32> -> vector<1x8x16xf32>
    "tpu.trace_stop"() : () -> ()
    %cst_68 = arith.constant 0.000000e+00 : f32
    %215 = vector.broadcast %cst_68 : f32 to vector<1x8x16xf32>
    %216 = arith.maximumf %214, %215 : vector<1x8x16xf32>
    %cst_69 = arith.constant dense<0xFF800000> : vector<1x8xf32>
    %217 = vector.multi_reduction <maximumf>, %216, %cst_69 [2] : vector<1x8x16xf32> to vector<1x8xf32>
    %218 = vector.shape_cast %217 : vector<1x8xf32> to vector<1x8x1xf32>
    %219 = vector.broadcast %218 : vector<1x8x1xf32> to vector<1x8x16xf32>
    %220 = arith.subf %216, %219 : vector<1x8x16xf32>
    %221 = math.exp %220 : vector<1x8x16xf32>
    %cst_70 = arith.constant dense<0.000000e+00> : vector<1x8xf32>
    %222 = vector.multi_reduction <add>, %221, %cst_70 [2] : vector<1x8x16xf32> to vector<1x8xf32>
    %223 = vector.shape_cast %222 : vector<1x8xf32> to vector<1x8x1xf32>
    %224 = tpu.reciprocal %223 {approx = true} : vector<1x8x1xf32> -> vector<1x8x1xf32>
    %225 = vector.broadcast %224 : vector<1x8x1xf32> to vector<1x8x16xf32>
    %226 = arith.mulf %221, %225 : vector<1x8x16xf32>
    %c0_71 = arith.constant 0 : index
    %c0_72 = arith.constant 0 : index
    %c0_73 = arith.constant 0 : index
    %227 = vector.load %arg8[%c0_71, %c0_72, %c0_73] : memref<1x8x16xf32, #tpu.memory_space<vmem>>, vector<1x8x16xf32>
    tpu.vector_store %arg8[%c0_71, %c0_72, %c0_73], %226 {strides = array<i32>} : memref<1x8x16xf32, #tpu.memory_space<vmem>>, vector<1x8x16xf32>,
    return
  }
  func.func @transform_0(%arg0: i32) -> (i32, i32) {
    %c0_i32 = arith.constant 0 : i32
    %c0_i32_0 = arith.constant 0 : i32
    return %arg0, %c0_i32 : i32, i32
  }
  func.func @transform_1(%arg0: i32) -> (i32, i32, i32) {
    %c0_i32 = arith.constant 0 : i32
    %c0_i32_0 = arith.constant 0 : i32
    %c0_i32_1 = arith.constant 0 : i32
    return %arg0, %c0_i32, %c0_i32_0 : i32, i32, i32
  }
  func.func @transform_2(%arg0: i32) -> (i32, i32) {
    %c0_i32 = arith.constant 0 : i32
    %c0_i32_0 = arith.constant 0 : i32
    %c0_i32_1 = arith.constant 0 : i32
    return %c0_i32, %c0_i32_0 : i32, i32
  }
  func.func @transform_3(%arg0: i32) -> (i32, i32) {
    %c0_i32 = arith.constant 0 : i32
    %c0_i32_0 = arith.constant 0 : i32
    %c0_i32_1 = arith.constant 0 : i32
    return %c0_i32, %c0_i32_0 : i32, i32
  }
  func.func @transform_4(%arg0: i32) -> (i32, i32) {
    %c0_i32 = arith.constant 0 : i32
    %c0_i32_0 = arith.constant 0 : i32
    %c0_i32_1 = arith.constant 0 : i32
    return %c0_i32, %c0_i32_0 : i32, i32
  }
  func.func @transform_5(%arg0: i32) -> (i32, i32) {
    %c0_i32 = arith.constant 0 : i32
    %c0_i32_0 = arith.constant 0 : i32
    %c0_i32_1 = arith.constant 0 : i32
    return %c0_i32, %c0_i32_0 : i32, i32
  }
  func.func @transform_6(%arg0: i32) -> (i32, i32) {
    %c0_i32 = arith.constant 0 : i32
    %c0_i32_0 = arith.constant 0 : i32
    %c0_i32_1 = arith.constant 0 : i32
    return %c0_i32, %c0_i32_0 : i32, i32
  }
  func.func @transform_7(%arg0: i32) -> (i32, i32, i32) {
    %c0_i32 = arith.constant 0 : i32
    %c0_i32_0 = arith.constant 0 : i32
    %c0_i32_1 = arith.constant 0 : i32
    return %arg0, %c0_i32, %c0_i32_0 : i32, i32, i32
  }
}

</mosaic_0001>

<bundles_post_ra>
// kernel: tpu_custom_call.1
= control target key start
LH: loop header
LB: loop body
LE: loop exit
PB: predicated region body
PF: predicated region fallthrough
CT: control target
= control target key end

     0   :  { %12 = vsyncpa [#allocation3], 0  ;;  %s1508_s0 = inlined_call_operand.vmem [shape: f32[16,8], index: 0, kind: input, shape index: {}]   ;;  %s1509_s1 = inlined_call_operand.vmem [shape: f32[2,8,8], index: 1, kind: input, shape index: {}]   ;;  %s1510_s2 = inlined_call_operand.vmem [shape: f32[8,32], index: 2, kind: input, shape index: {}]   ;;  %s1511_s3 = inlined_call_operand.vmem [shape: f32[1,32], index: 3, kind: input, shape index: {}]   ;;  %s1512_s4 = inlined_call_operand.vmem [shape: f32[32,8], index: 4, kind: input, shape index: {}]   ;;  %s1513_s5 = inlined_call_operand.vmem [shape: f32[1,8], index: 5, kind: input, shape index: {}]   ;;  %s1514_s6 = inlined_call_operand.vmem [shape: f32[8,16], index: 6, kind: input, shape index: {}]   ;;  %s1515_s7 = inlined_call_operand.hbm [shape: f32[2,8,16], index: 7, kind: output, shape index: {}]  }
   0x1   :  { %14 = vsyncpa [#allocation3 + $0x1], 0  ;;  %s1282_s24 = smov 0   ;;  %s1284_s25 = smov 0  }
   0x2   :  { %s1286_s26 = smov 0   ;;  %s1288_s27 = smov 0  }
   0x3 LB: > { %s1303_s28 = sadd.s32 4294967295, %s1206_s27   ;;  %s982_s29 = sadd.s32 4294967294, %s1206_s27   ;;  %s1206_s27 = sphi %s1288_s27, %s1521_s27   ;;  %s1202_s26 = sphi %s1286_s26, %s1520_s26   ;;  %s1198_s25 = sphi %s1284_s25, %s1519_s25   ;;  %s1194_s24 = sphi %s1282_s24, %s1518_s24  }
   0x4   : > { %s1307_s30 = sadd.s32 1, %s1206_s27   ;;  %s184_s8 = sadd.s32 1, %s1202_s26 }
   0x5   : > { %s181_s9 = ssub.s32 %s1206_s27, %s1307_s30  ;;  %p194_p0 = scmp.ne.s32.totalorder %s1202_s26, %s1198_s25 }
   0x6   : > { %p182_p1 = scmp.eq.s32.totalorder %s181_s9, 0  ;;  %p195_p2 = scmp.eq.s32.totalorder %s1303_s28, 1 }
   0x7   : > { %p200_p3 = scmp.ne.s32.totalorder %s1198_s25, %s1194_s24  ;;  %p201_p4 = scmp.eq.s32.totalorder %s982_s29, 1 }
   0x8   : > { %s1318_s10 = scalar_select %p182_p1, %s1202_s26, %s184_s8  }
   0x9   : > { %p1320_p5 = por %p195_p2, %p194_p0  ;;  %p1324_p6 = por %p201_p4, %p200_p3 }
   0xa   : > { %p985_p7 = scmp.ge.s32.totalorder %s1206_s27, 1  ;;  %p248_p8 = scmp.lt.s32.totalorder %s1206_s27, 3 }
   0xc   : > { %p249_p9 = pnand %p985_p7, %p248_p8 }
   0xd   : > { %p283_p10 = scmp.lt.s32.totalorder (!%p249_p9), %s1303_s28, 1  ;;  %s1226_s22 = smov (!%p249_p9), 127  }
   0xe   : > { %252 = sbr.rel (%p249_p9) target bundleno = 1681 (0x691), region = 48  ;;  %s1227_s23 = smov (!%p249_p9), 124  }
   0xf   : > { %s1228_s29 = smov (!%p249_p9), 126   ;;  %s1229_s8 = smov (!%p249_p9), 125  }
  0x10   : > { %s1230_s9 = smov (!%p249_p9), 122   ;;  %s1231_s13 = smov (!%p249_p9), 123  }
  0x11   : > { %s1232_s14 = smov (!%p249_p9), 121   ;;  %s1233_s15 = smov (!%p249_p9), 120  }
  0x12   : > { %s1234_s16 = smov (!%p249_p9), 119   ;;  %s1235_s19 = smov (!%p249_p9), 118  }
  0x13   : > { %v292_v0 = vld [vmem:[%s1510_s2] sm:$0xff]  ;;  %v378_v1 = vld [vmem:[%s1512_s4 + $0x18] sm:$0xff]  ;;  %v1208_v2 = vmov 0.0   ;;  %vm1209_vm0 = vmmov 0   ;;  %s1341_s17 = scalar_select %p283_p10, %s1303_s28, 1  ;;  %vm300_vm1 = vcmask 64512  }
  0x14   : > { %1027 = vmatprep.subr.mxu0 %v1208_v2  ;;  %1029 = vmatprep.mubr.msk.f32.mxu0 %vm1209_vm0, %v1208_v2  ;;  %v377_v4 = vld [vmem:[%s1512_s4 + $0x10] sm:$0xff]  ;;  %v376_v5 = vld [vmem:[%s1512_s4 + $0x8] sm:$0xff]  ;;  %v375_v6 = vld [vmem:[%s1512_s4] sm:$0xff]  ;;  %vm386_vm2 = vcmask 261120   ;;  %v1210_v13 = vmov 3   ;;  %v1211_v14 = vmov 1  }
  0x15   : > { %1028 = vmatpush3.msra.mxu0 %v292_v0  ;;  %1032 = vmatprep.subr.mxu1 %v1208_v2  ;;  %s987_s18 = sshll.u32 %s1341_s17, 3  ;;  %v989_v7 = vld [vmem:[%s1511_s3] ss:$0 sm:$0xff]  ;;  %v1212_v21 = vmov 4   ;;  %v1213_v22 = vmov 2   ;;  %v1214_v23 = vmov 5  }
  0x16   : > { %1033 = vmatpush3.msra.mxu1 %v378_v1  ;;  %1040 = vmatprep.mubr.msk.f32.mxu1 %vm1209_vm0, %v1208_v2  ;;  %s286_s21 = scalar_lea.vmem %s1508_s0, %s987_s18  ;;  %v460_v12 = vld [vmem:[%s1514_s6] sm:$0xff]  ;;  %v1215_v24 = vmov 6   ;;  %v1216_v25 = vmov 7   ;;  %v1217_v26 = vmov 9   ;;  %v1218_v27 = vmov 8   ;;  %s1236_s20 = smov 116  }
  0x17   : > { %1034 = vmatprep.subr.mxu1 %v1208_v2  ;;  %1043 = vmatprep.subr.mxu0 %v1208_v2  ;;  %v291_v3 = vld [vmem:[%s286_s21] sm:$0xff]  ;;  %v1219_v28 = vmov 12   ;;  %v1220_v29 = vmov 10   ;;  %v1221_v30 = vmov 15   ;;  %v1222_v31 = vmov 11   ;;  %s1237_s21 = smov 117  }
  0x18   : > { %1030 = vmatmul.mubr.msk.f32.vlgmr.msra.gmra.mxu0 %vm300_vm1, %v291_v3  ;;  %1035 = vmatpush3.msra.mxu1 %v377_v4  ;;  %v991_v15 = vld [vmem:[%s1513_s5] ss:$0 sm:$0xff]  ;;  %v1223_v32 = vmov 0   ;;  %v1224_v33 = vmov 13   ;;  %v1225_v34 = vmov 14   ;;  %vm542_vm3 = vcmask 130048  }
  0x19   : > { %1045 = vmatprep.mubr.msk.f32.mxu0 %vm1209_vm0, %v1208_v2  ;;  %1036 = vmatprep.subr.mxu1 %v1208_v2  ;;  %s280_s17 = sand.u32 1, %s1198_s25  }
  0x1a   : > { %1037 = vmatpush3.msra.mxu1 %v376_v5  ;;  %1044 = vmatpush3.msra.mxu0 %v460_v12 }
  0x1b   : > { %1038 = vmatprep.subr.mxu1 %v1208_v2  ;;  %1048 = vmatprep.subr.mxu0 %v1208_v2 }
  0x1c   : > { %1039 = vmatpush3.msra.mxu1 %v375_v6  ;;  %1127 = vset.pattern.permute.xlu1 %v1210_v13 }
  0x1d   : > { %1125 = vset.pattern.permute.xlu0 %v1211_v14 }
  0xd8   : > { %v370_v8 = vpop.f32.mrf.mxu0 }
  0xd9   : > { %v371_v9 = vadd.f32 %v989_v7, %v370_v8 }
  0xda   : > { %v1031_v10 = vpop.f32.mrf.mxu0 }
  0xdb   : > { %v374_v11 = vmax.f32 %v371_v9, 0.0 }
  0xdd   : > { %1041 = vmatmul.mubr.msk.f32.vlgmr.msra.gmra.mxu1 %vm386_vm2, %v374_v11 }
 0x19d   : > { %v456_v16 = vpop.f32.mrf.mxu1 }
 0x19e   : > { %v457_v17 = vadd.f32 %v991_v15, %v456_v16 }
 0x19f   : > { %v1042_v18 = vpop.f32.mrf.mxu1 }
 0x1a0   : > { %1046 = vmatmul.mubr.msk.f32.vlgmr.msra.gmra.mxu0 %vm300_vm1, %v457_v17 }
 0x1a1   : > { %1050 = vmatprep.mubr.msk.f32.mxu0 %vm1209_vm0, %v1208_v2 }
 0x260   : > { %v1381_v19 = vpop.f32.mrf.mxu0 }
 0x261   : > { %583 = vperm.xlu1 %1127, %v1381_v19   ;;  %549 = vperm.xlu0 %1125, %v1381_v19  }
 0x262   : > { %v1047_v20 = vpop.f32.mrf.mxu0 }
 0x265   : > { %1128 = vset.pattern.permute.xlu1 %v1212_v21  ;;  %1126 = vset.pattern.permute.xlu0 %v1213_v22 }
 0x266   : > { %600 = vperm.xlu1 %1128, %v1381_v19   ;;  %566 = vperm.xlu0 %1126, %v1381_v19  }
 0x26a   : > { %1129 = vset.pattern.permute.xlu1 %v1214_v23  ;;  %1130 = vset.pattern.permute.xlu0 %v1215_v24 }
 0x26b   : > { %617 = vperm.xlu1 %1129, %v1381_v19   ;;  %634 = vperm.xlu0 %1130, %v1381_v19  }
 0x26f   : > { %1131 = vset.pattern.permute.xlu1 %v1216_v25  ;;  %1133 = vset.pattern.permute.xlu0 %v1217_v26 }
 0x270   : > { %651 = vperm.xlu1 %1131, %v1381_v19   ;;  %685 = vperm.xlu0 %1133, %v1381_v19  }
 0x274   : > { %1132 = vset.pattern.permute.xlu1 %v1218_v27  ;;  %1136 = vset.pattern.permute.xlu0 %v1219_v28 }
 0x275   : > { %668 = vperm.xlu1 %1132, %v1381_v19   ;;  %736 = vperm.xlu0 %1136, %v1381_v19  }
 0x279   : > { %1134 = vset.pattern.permute.xlu1 %v1220_v29  ;;  %1139 = vset.pattern.permute.xlu0 %v1221_v30 }
 0x27a   : > { %702 = vperm.xlu1 %1134, %v1381_v19   ;;  %787 = vperm.xlu0 %1139, %v1381_v19  }
 0x27e   : > { %1135 = vset.pattern.permute.xlu1 %v1222_v31  ;;  %1141 = vset.pattern.permute.xlu0 %v1223_v32 }
 0x27f   : > { %719 = vperm.xlu1 %1135, %v1381_v19  }
 0x283   : > { %1137 = vset.pattern.permute.xlu1 %v1224_v33 }
 0x284   : > { %753 = vperm.xlu1 %1137, %v1381_v19  }
 0x288   : > { %1138 = vset.pattern.permute.xlu1 %v1225_v34 }
 0x289   : > { %770 = vperm.xlu1 %1138, %v1381_v19  }
 0x28d   : > { %1140 = vset.pattern.permute.xlu1 %v1223_v32 }
 0x28e   : > { %536 = vperm.xlu1 %1140, %v1381_v19  }
 0x2dc   : > { %v584_v35 = vpop.permute.xlu1 %583  ;;  %v550_v36 = vpop.permute.xlu0 %549 }
 0x2dd   : > { %vm552_vm4 = vcmp.ge.f32.partialorder %v1381_v19, %v550_v36  ;;  %vm586_vm5 = vcmp.ge.f32.partialorder %v1381_v19, %v584_v35 }
 0x2de   : > { %v995_v37 = vsel %vm552_vm4, 1.0, %v1208_v2  ;;  %v997_v45 = vsel %vm586_vm5, 1.0, %v1208_v2 }
 0x2df   : > { %v555_v38 = vsel %vm542_vm3, %v995_v37, 0.0  ;;  %v589_v48 = vsel %vm542_vm3, %v997_v45, 0.0 }
 0x2e0   : > { %556 = vadd.xlane.f32.xlu1 %v555_v38 }
 0x2e1   : > { %v601_v39 = vpop.permute.xlu1 %600  ;;  %v567_v40 = vpop.permute.xlu0 %566 }
 0x2e2   : > { %vm603_vm6 = vcmp.ge.f32.partialorder %v1381_v19, %v601_v39  ;;  %vm569_vm7 = vcmp.ge.f32.partialorder %v1381_v19, %v567_v40 }
 0x2e3   : > { %v998_v41 = vsel %vm603_vm6, 1.0, %v1208_v2  ;;  %v996_v42 = vsel %vm569_vm7, 1.0, %v1208_v2 }
 0x2e4   : > { %v606_v43 = vsel %vm542_vm3, %v998_v41, 0.0  ;;  %v572_v44 = vsel %vm542_vm3, %v996_v42, 0.0 }
 0x2e5   : > { %607 = vadd.xlane.f32.xlu1 %v606_v43  ;;  %573 = vadd.xlane.f32.xlu0 %v572_v44 }
 0x2e6   : > { %v618_v46 = vpop.permute.xlu1 %617  ;;  %v635_v47 = vpop.permute.xlu0 %634 }
 0x2e7   : > { %vm620_vm8 = vcmp.ge.f32.partialorder %v1381_v19, %v618_v46  ;;  %vm637_vm9 = vcmp.ge.f32.partialorder %v1381_v19, %v635_v47 }
 0x2e8   : > { %v1000_v49 = vsel %vm637_vm9, 1.0, %v1208_v2  ;;  %v999_v51 = vsel %vm620_vm8, 1.0, %v1208_v2 }
 0x2e9   : > { %590 = vadd.xlane.f32.xlu0 %v589_v48  ;;  %v640_v50 = vsel %vm542_vm3, %v1000_v49, 0.0  ;;  %v623_v54 = vsel %vm542_vm3, %v999_v51, 0.0 }
 0x2ea   : > { %641 = vadd.xlane.f32.xlu1 %v640_v50 }
 0x2eb   : > { %v652_v52 = vpop.permute.xlu1 %651  ;;  %v686_v53 = vpop.permute.xlu0 %685 }
 0x2ec   : > { %vm654_vm10 = vcmp.ge.f32.partialorder %v1381_v19, %v652_v52  ;;  %vm688_vm11 = vcmp.ge.f32.partialorder %v1381_v19, %v686_v53 }
 0x2ed   : > { %624 = vadd.xlane.f32.xlu0 %v623_v54  ;;  %v1001_v55 = vsel %vm654_vm10, 1.0, %v1208_v2  ;;  %v1003_v58 = vsel %vm688_vm11, 1.0, %v1208_v2 }
 0x2ee   : > { %v657_v57 = vsel %vm542_vm3, %v1001_v55, 0.0  ;;  %v691_v62 = vsel %vm542_vm3, %v1003_v58, 0.0 }
 0x2f0   : > { %v669_v56 = vpop.permute.xlu1 %668  ;;  %v737_v60 = vpop.permute.xlu0 %736 }
 0x2f1   : > { %vm671_vm12 = vcmp.ge.f32.partialorder %v1381_v19, %v669_v56  ;;  %658 = vadd.xlane.f32.xlu0 %v657_v57  ;;  %vm739_vm13 = vcmp.ge.f32.partialorder %v1381_v19, %v737_v60 }
 0x2f2   : > { %v1002_v59 = vsel %vm671_vm12, 1.0, %v1208_v2  ;;  %v1006_v3 = vsel %vm739_vm13, 1.0, %v1208_v2 }
 0x2f3   : > { %v674_v61 = vsel %vm542_vm3, %v1002_v59, 0.0  ;;  %v742_v5 = vsel %vm542_vm3, %v1006_v3, 0.0 }
 0x2f4   : > { %675 = vadd.xlane.f32.xlu1 %v674_v61 }
 0x2f5   : > { %v703_v63 = vpop.permute.xlu1 %702  ;;  %692 = vadd.xlane.f32.xlu0 %v691_v62  ;;  %v788_v7 = vpop.permute.xlu0 %787 }
 0x2f6   : > { %vm705_vm14 = vcmp.ge.f32.partialorder %v1381_v19, %v703_v63  ;;  %vm790_vm0 = vcmp.ge.f32.partialorder %v1381_v19, %v788_v7 }
 0x2f7   : > { %v1004_v0 = vsel %vm705_vm14, 1.0, %v1208_v2  ;;  %v1009_v12 = vsel %vm790_vm0, 1.0, %v1208_v2 }
 0x2f8   : > { %v708_v1 = vsel %vm542_vm3, %v1004_v0, 0.0  ;;  %v793_v14 = vsel %vm542_vm3, %v1009_v12, 0.0 }
 0x2f9   : > { %709 = vadd.xlane.f32.xlu1 %v708_v1 }
 0x2fa   : > { %v720_v4 = vpop.permute.xlu1 %719 }
 0x2fb   : > { %vm722_vm15 = vcmp.ge.f32.partialorder %v1381_v19, %v720_v4 }
 0x2fc   : > { %v1005_v6 = vsel %vm722_vm15, 1.0, %v1208_v2 }
 0x2fd   : > { %743 = vadd.xlane.f32.xlu1 %v742_v5  ;;  %v725_v8 = vsel %vm542_vm3, %v1005_v6, 0.0 }
 0x2fe   : > { %726 = vadd.xlane.f32.xlu0 %v725_v8 }
 0x2ff   : > { %v754_v9 = vpop.permute.xlu1 %753 }
 0x300   : > { %vm756_vm2 = vcmp.ge.f32.partialorder %v1381_v19, %v754_v9 }
 0x301   : > { %v1007_v10 = vsel %vm756_vm2, 1.0, %v1208_v2 }
 0x302   : > { %v759_v11 = vsel %vm542_vm3, %v1007_v10, 0.0 }
 0x303   : > { %760 = vadd.xlane.f32.xlu0 %v759_v11 }
 0x304   : > { %v771_v13 = vpop.permute.xlu1 %770 }
 0x305   : > { %vm773_vm4 = vcmp.ge.f32.partialorder %v1381_v19, %v771_v13 }
 0x306   : > { %v1008_v15 = vsel %vm773_vm4, 1.0, %v1208_v2 }
 0x307   : > { %794 = vadd.xlane.f32.xlu0 %v793_v14  ;;  %v776_v16 = vsel %vm542_vm3, %v1008_v15, 0.0 }
 0x308   : > { %777 = vadd.xlane.f32.xlu1 %v776_v16 }
 0x309   : > { %v537_v17 = vpop.permute.xlu1 %536 }
 0x30a   : > { %vm539_vm5 = vcmp.ge.f32.partialorder %v1381_v19, %v537_v17 }
 0x30b   : > { %v994_v18 = vsel %vm539_vm5, 1.0, %v1208_v2 }
 0x30c   : > { %v543_v20 = vsel %vm542_vm3, %v994_v18, 0.0 }
 0x30d   : > { %544 = vadd.xlane.f32.xlu1 %v543_v20 }
 0x369   : > { %v557_v21 = vpop.xlane.xlu1 %556 }
 0x36a   : > { %vm558_vm6 = vcmp.ge.f32.partialorder %v557_v21, 8.0 }
 0x36b   : > { %v559_v22 = vsel %vm558_vm6, %v1381_v19, -inf }
 0x36c   : > { %561 = vrot.lane.b32.xlu0 %v559_v22, %s1226_s22  ;;  %s1238_s22 = smov 115  }
 0x36e   : > { %v608_v23 = vpop.xlane.xlu1 %607  ;;  %v574_v24 = vpop.xlane.xlu0 %573 }
 0x36f   : > { %vm609_vm7 = vcmp.ge.f32.partialorder %v608_v23, 8.0  ;;  %vm575_vm8 = vcmp.ge.f32.partialorder %v574_v24, 8.0 }
 0x370   : > { %v610_v25 = vsel %vm609_vm7, %v1381_v19, -inf  ;;  %v576_v26 = vsel %vm575_vm8, %v1381_v19, -inf }
 0x371   : > { %612 = vrot.lane.b32.xlu0 %v610_v25, %s1227_s23  ;;  %578 = vrot.lane.b32.xlu1 %v576_v26, %s1228_s29  ;;  %s1239_s23 = smov 113   ;;  %s1240_s29 = smov 114  }
 0x372   : > { %v591_v2 = vpop.xlane.xlu0 %590 }
 0x373   : > { %vm592_vm9 = vcmp.ge.f32.partialorder %v591_v2, 8.0  ;;  %v642_v27 = vpop.xlane.xlu1 %641 }
 0x374   : > { %v593_v28 = vsel %vm592_vm9, %v1381_v19, -inf  ;;  %vm643_vm10 = vcmp.ge.f32.partialorder %v642_v27, 8.0 }
 0x375   : > { %v644_v29 = vsel %vm643_vm10, %v1381_v19, -inf  ;;  %595 = vrot.lane.b32.xlu1 %v593_v28, %s1229_s8 }
 0x376   : > { %646 = vrot.lane.b32.xlu0 %v644_v29, %s1230_s9  ;;  %v625_v30 = vpop.xlane.xlu0 %624 }
 0x377   : > { %vm626_vm11 = vcmp.ge.f32.partialorder %v625_v30, 8.0 }
 0x378   : > { %v627_v31 = vsel %vm626_vm11, %v1381_v19, -inf }
 0x379   : > { %629 = vrot.lane.b32.xlu1 %v627_v31, %s1231_s13  ;;  %s290_s13 = scalar_lea.vmem %s1509_s1, %s987_s18  ;;  %s986_s18 = sshll.u32 %s280_s17, 3 }
 0x37a   : > { %v659_v32 = vpop.xlane.xlu0 %658  ;;  %v810_v21 = vld [vmem:[%s290_s13] sm:$0xff] }
 0x37b   : > { %vm660_vm12 = vcmp.ge.f32.partialorder %v659_v32, 8.0 }
 0x37c   : > { %v661_v33 = vsel %vm660_vm12, %v1381_v19, -inf }
 0x37d   : > { %v676_v34 = vpop.xlane.xlu1 %675  ;;  %663 = vrot.lane.b32.xlu1 %v661_v33, %s1232_s14  ;;  %s1013_s14 = sshll.u32 %s1303_s28, 7 }
 0x37e   : > { %vm677_vm13 = vcmp.ge.f32.partialorder %v676_v34, 8.0  ;;  %v693_v35 = vpop.xlane.xlu0 %692 }
 0x37f   : > { %v678_v36 = vsel %vm677_vm13, %v1381_v19, -inf  ;;  %vm694_vm14 = vcmp.ge.f32.partialorder %v693_v35, 8.0 }
 0x380   : > { %v695_v37 = vsel %vm694_vm14, %v1381_v19, -inf  ;;  %680 = vrot.lane.b32.xlu0 %v678_v36, %s1233_s15  ;;  %s282_s15 = scalar_lea.vmem [#allocation2], %s986_s18 }
 0x381   : > { %697 = vrot.lane.b32.xlu1 %v695_v37, %s1234_s16  ;;  %s911_s16 = sshll.u32 %s282_s15, 4  ;;  %s912_s16 = int_to_ptr.vmem [resolvable:$true] %s911_s16 }
 0x382   : > { %v710_v38 = vpop.xlane.xlu1 %709 }
 0x383   : > { %vm711_vm15 = vcmp.ge.f32.partialorder %v710_v38, 8.0 }
 0x384   : > { %v712_v39 = vsel %vm711_vm15, %v1381_v19, -inf }
 0x385   : > { %714 = vrot.lane.b32.xlu0 %v712_v39, %s1235_s19 }
 0x386   : > { %v744_v40 = vpop.xlane.xlu1 %743 }
 0x387   : > { %vm745_vm0 = vcmp.ge.f32.partialorder %v744_v40, 8.0  ;;  %v727_v41 = vpop.xlane.xlu0 %726 }
 0x388   : > { %v746_v42 = vsel %vm745_vm0, %v1381_v19, -inf  ;;  %vm728_vm2 = vcmp.ge.f32.partialorder %v727_v41, 8.0 }
 0x389   : > { %v729_v43 = vsel %vm728_vm2, %v1381_v19, -inf  ;;  %748 = vrot.lane.b32.xlu0 %v746_v42, %s1236_s20 }
 0x38a   : > { %731 = vrot.lane.b32.xlu1 %v729_v43, %s1237_s21  ;;  %s909_s21 = scalar_lea.hbm %s1515_s7, %s1013_s14 }
 0x38c   : > { %v761_v44 = vpop.xlane.xlu0 %760 }
 0x38d   : > { %vm762_vm4 = vcmp.ge.f32.partialorder %v761_v44, 8.0 }
 0x38e   : > { %v763_v45 = vsel %vm762_vm4, %v1381_v19, -inf }
 0x38f   : > { %765 = vrot.lane.b32.xlu1 %v763_v45, %s1238_s22  ;;  %s898_s22 = scalar_lea.sflag [#allocation3], %s280_s17 }
 0x390   : > { %v795_v46 = vpop.xlane.xlu0 %794 }
 0x391   : > { %vm796_vm5 = vcmp.ge.f32.partialorder %v795_v46, 8.0  ;;  %v778_v47 = vpop.xlane.xlu1 %777 }
 0x392   : > { %v797_v48 = vsel %vm796_vm5, %v1381_v19, -inf  ;;  %vm779_vm6 = vcmp.ge.f32.partialorder %v778_v47, 8.0 }
 0x393   : > { %v780_v49 = vsel %vm779_vm6, %v1381_v19, -inf  ;;  %799 = vrot.lane.b32.xlu1 %v797_v48, %s1239_s23  ;;  %s1146_s23 = scalar_lea.vmem %s912_s16, 128 }
 0x394   : > { %782 = vrot.lane.b32.xlu0 %v780_v49, %s1240_s29  ;;  %p1147_p11 = scmp.ne.s32.totalorder %s912_s16, %s1146_s23  ;;  %s1241_s29 = smov [#allocation2]  }
 0x395   : > { %s1150_s8 = sshll.u32 %s1241_s29, 4  ;;  %s1151_s8 = int_to_ptr.vmem [resolvable:$false] %s1150_s8 }
 0x396   : > { %v545_v50 = vpop.xlane.xlu1 %544  ;;  %p1148_p12 = pnand %p1147_p11, %p1320_p5  ;;  %s1152_s28 = scalar_lea.vmem %s1151_s8, 256 }
 0x397   : > { %vm546_vm7 = vcmp.ge.f32.partialorder %v545_v50, 8.0  ;;  %p1153_p0 = scmp.lt.s32.totalorder %s912_s16, %s1151_s8  ;;  %p1154_p1 = scmp.lt.s32.totalorder %s1152_s28, %s1146_s23 }
 0x398   : > { %v547_v52 = vsel %vm546_vm7, %v1381_v19, -inf  ;;  %p1149_p13 = pneg %p1148_p12 }
 0x399   : > { %p1155_p2 = por %p1154_p1, %p1153_p0 }
 0x39b   : > { %p1156_p3 = pnand %p1155_p2, %p1149_p13 }
 0x3de   : > { %v562_v51 = vpop.permute.xlu0 %561 }
 0x3df   : > { %v564_v54 = vmax.f32 %v547_v52, %v562_v51 }
 0x3e3   : > { %v579_v53 = vpop.permute.xlu1 %578  ;;  %v613_v56 = vpop.permute.xlu0 %612 }
 0x3e4   : > { %v581_v55 = vmax.f32 %v564_v54, %v579_v53 }
 0x3e7   : > { %v596_v57 = vpop.permute.xlu1 %595 }
 0x3e8   : > { %v598_v58 = vmax.f32 %v581_v55, %v596_v57  ;;  %v647_v62 = vpop.permute.xlu0 %646 }
 0x3ea   : > { %v615_v59 = vmax.f32 %v598_v58, %v613_v56 }
 0x3eb   : > { %v630_v60 = vpop.permute.xlu1 %629 }
 0x3ec   : > { %v632_v61 = vmax.f32 %v615_v59, %v630_v60 }
 0x3ee   : > { %v649_v63 = vmax.f32 %v632_v61, %v647_v62 }
 0x3ef   : > { %v664_v0 = vpop.permute.xlu1 %663 }
 0x3f0   : > { %v666_v1 = vmax.f32 %v649_v63, %v664_v0 }
 0x3f2   : > { %v681_v3 = vpop.permute.xlu0 %680 }
 0x3f3   : > { %v683_v4 = vmax.f32 %v666_v1, %v681_v3  ;;  %v698_v5 = vpop.permute.xlu1 %697 }
 0x3f5   : > { %v700_v6 = vmax.f32 %v683_v4, %v698_v5 }
 0x3f7   : > { %v715_v7 = vpop.permute.xlu0 %714 }
 0x3f8   : > { %v717_v8 = vmax.f32 %v700_v6, %v715_v7 }
 0x3fb   : > { %v749_v11 = vpop.permute.xlu0 %748 }
 0x3fc   : > { %v732_v9 = vpop.permute.xlu1 %731 }
 0x3fd   : > { %v734_v10 = vmax.f32 %v717_v8, %v732_v9 }
 0x3ff   : > { %v751_v12 = vmax.f32 %v734_v10, %v749_v11 }
 0x401   : > { %v766_v13 = vpop.permute.xlu1 %765 }
 0x402   : > { %v768_v14 = vmax.f32 %v751_v12, %v766_v13 }
 0x405   : > { %v800_v17 = vpop.permute.xlu1 %799 }
 0x406   : > { %v783_v15 = vpop.permute.xlu0 %782 }
 0x407   : > { %v785_v16 = vmax.f32 %v768_v14, %v783_v15 }
 0x409   : > { %v802_v18 = vmax.f32 %v785_v16, %v800_v17 }
 0x40b   : > { %805 = vperm.xlu0 %1141, %v802_v18  }
 0x486   : > { %v806_v20 = vpop.permute.xlu0 %805 }
 0x487   : > { %vm808_vm8 = vcmp.ge.f32.partialorder %v1381_v19, %v806_v20 }
 0x488   : > { %1049 = vmatpush3.msk.msra.mxu0 %vm808_vm8, %v1381_v19 }
 0x489   : > { %1051 = vmatmul.mubr.msk.f32.vlgmr.msra.gmra.mxu0 %vm300_vm1, %v810_v21 }
 0x549   : > { %v880_v22 = vpop.f32.mrf.mxu0 }
 0x54a   : > { %v884_v23 = vmax.f32 %v880_v22, 0.0 }
 0x54b   : > { %v1052_v24 = vpop.f32.mrf.mxu0 }
 0x54c   : > { %v885_v25 = vsel %vm542_vm3, %v884_v23, -inf }
 0x54d   : > { %886 = vmax.xlane.f32.xlu1 %v885_v25 }
 0x5d6   : > { %v887_v26 = vpop.xlane.xlu1 %886 }
 0x5d7   : > { %v888_v2 = vsub.f32 %v884_v23, %v887_v26 }
 0x5d9   : > { %v889_v27 = vmul.f32 1.442695, %v888_v2 }
 0x5db   : > { %1142 = vpow2.f32 %v889_v27 }
 0x5e8   : > { %v1143_v28 = vpop.eup %1142 }
 0x5e9   : > { %v891_v29 = vsel %vm542_vm3, %v1143_v28, 0.0 }
 0x5ea   : > { %892 = vadd.xlane.f32.xlu0 %v891_v29 }
 0x673   : > { %v893_v19 = vpop.xlane.xlu0 %892 }
 0x674   : > { %1144 = vrcp.f32 %v893_v19 }
 0x681   : > { %v1145_v30 = vpop.eup %1144 }
 0x682   : > { %v895_v31 = vmul.f32 %v1145_v30, %v1143_v28 }
 0x684   : > { %896 = vst.msk [vmem:[%s282_s15] sm:$0xff] %vm542_vm3, %v895_v31 }
 0x685   : > { %1159 = shalt.err (!%p1156_p3)
}
 0x686   : > { %s1160_s9 = scalar_lea.hbm %s909_s21, 128  ;;  %s1164_s18 = scalar_lea.hbm %s1515_s7, 256 }
 0x687   : > { %p1161_p4 = scmp.ne.s32.totalorder %s909_s21, %s1160_s9  ;;  %p1165_p9 = scmp.lt.s32.totalorder %s909_s21, %s1515_s7 }
 0x688   : > { %p1166_p10 = scmp.lt.s32.totalorder %s1164_s18, %s1160_s9 }
 0x689   : > { %p1162_p7 = pnand %p1161_p4, %p1320_p5 }
 0x68a   : > { %p1167_p11 = por %p1166_p10, %p1165_p9 }
 0x68b   : > { %p1163_p8 = pneg %p1162_p7 }
 0x68d   : > { %p1168_p12 = pnand %p1167_p11, %p1163_p8 }
 0x68f   : > { %1171 = shalt.err (!%p1168_p12)
}
 0x690   : > { %1053 = dma.vmem_to_hbm [thread:$0]  (%p1320_p5), %s912_s16, 128, %s909_s21, %s898_s22  }
 0x691 PF: > { %p1059_p13 = scmp.ge.s32.totalorder %s1206_s27, 2  ;;  %s923_s19 = sand.u32 1, %s1194_s24  }
 0x692   : > { %s924_s20 = scalar_lea.sflag [#allocation3], %s923_s19 }
 0x693   : > { %p1056_p0 = pnand %p1059_p13, %p1324_p6 }
 0x695   : > { %p1057_p1 = pneg %p1056_p0 }
 0x697   : > { %1189 = dma.done.wait (%p1057_p1), %s924_s20, 128  }
 0x698   : > { %1191 = vsyncadd (%p1057_p1), %s924_s20, 4294967168  ;;  %p17_p2 = scmp.ge.s32.totalorder %s1307_s30, 4   ;;  %s1518_s24 = smov %s1198_s25 }
 0x699   : > { %s1519_s25 = smov %s1202_s26  ;;  %s1520_s26 = smov %s1318_s10 }
 0x69a   : > { %s1521_s27 = smov %s1307_s30  ;;  %19 = sbr.rel (!%p17_p2) target bundleno = 3 (0x3), region = 86 }
 0x69f   :  { %929 = vsyncpa [#allocation3], 1 }
 0x6a0   :  { %931 = vsyncpa [#allocation3 + $0x1], 1 }

</bundles_post_ra>
